<compile_context>
chip_gen: v6e
topology: v6e:2x2x1
jax: 0.10.0
libtpu: 0.0.40
codegen_flags: <defaults>
</compile_context>

<pallas_src>
import functools

import jax
import jax.numpy as jnp
import numpy as np
from jax.experimental import pallas as pl
from jax.experimental.pallas import tpu as pltpu


def _round_up(a, m):
    return ((a + m - 1) // m) * m


# ------------------------------ Pallas kernel --------------------------------
def _mlp_kernel(x_ref, w1_ref, b1_ref, w2_ref, b2_ref, o_ref, acc_ref, *,
                activation, compute_dtype):
    """One (row-tile i, hidden-tile j) step of  y = act(x @ W1^T + b1) @ W2^T + b2.

    x_ref : (TM, D_PAD)     bf16 row tile of the flattened input
    w1_ref: (D_PAD, TH)     bf16 W1^T hidden-column block
    b1_ref: (1, TH)         fp32
    w2_ref: (TH, O_PAD)     bf16 W2^T hidden-row block
    b2_ref: (1, O_PAD)      fp32
    o_ref : (TM, O_PAD)     fp32 lane-dense output tile
    acc_ref:(TM, O_PAD)     fp32 accumulator scratch (lives across j)
    """
    j = pl.program_id(1)

    @pl.when(j == 0)
    def _init():
        acc_ref[...] = jnp.zeros_like(acc_ref)

    # matmul #1 on the MXU (bf16 x bf16 -> fp32 accum), bias + activation in fp32
    z = jnp.dot(x_ref[...], w1_ref[...], preferred_element_type=jnp.float32)
    z = z + b1_ref[...]
    if activation == "silu":
        h = z * jax.nn.sigmoid(z)              # EUP sigmoid + VPU mul, fp32
    elif activation == "relu":
        h = jnp.maximum(z, 0.0)
    elif activation == "squared_relu":
        r = jnp.maximum(z, 0.0)
        h = r * r
    else:
        raise ValueError(f"unknown activation: {activation}")

    # matmul #2: cast the hidden activation to bf16 for the MXU, accumulate fp32
    acc_ref[...] += jnp.dot(h.astype(compute_dtype), w2_ref[...],
                            preferred_element_type=jnp.float32)

    @pl.when(j == pl.num_programs(1) - 1)
    def _finalize():
        # dropout: identity (dropout=None / eval semantics)
        o_ref[...] = (acc_ref[...] + b2_ref[...]).astype(o_ref.dtype)


# --------------------------- one-time param prep ------------------------------
def prepare_mlp_params(w1, b1, w2, b2, *, lane_align=128,
                       compute_dtype=jnp.bfloat16):
    """Transpose + zero-pad + bf16-cast the weights ONCE (reused every forward).

    w1: (hidden, dim), b1: (hidden,)   -- torch nn.Linear weight layout
    w2: (out_dim, hidden), b2: (out_dim,)
    """
    hidden, dim = w1.shape
    out_dim = w2.shape[0]
    d_pad = _round_up(dim, 128)            # fill the MXU pipeline depth (K)
    h_pad = _round_up(hidden, lane_align)  # lane-dense hidden activation
    o_pad = _round_up(out_dim, lane_align) # lane-dense output -> unmasked vst

    w1t = jnp.zeros((d_pad, h_pad), compute_dtype) \
             .at[:dim, :hidden].set(w1.T.astype(compute_dtype))
    b1p = jnp.zeros((1, h_pad), jnp.float32).at[0, :hidden].set(
        b1.astype(jnp.float32))
    w2t = jnp.zeros((h_pad, o_pad), compute_dtype) \
             .at[:hidden, :out_dim].set(w2.T.astype(compute_dtype))
    b2p = jnp.zeros((1, o_pad), jnp.float32).at[0, :out_dim].set(
        b2.astype(jnp.float32))

    return dict(w1t=w1t, b1=b1p, w2t=w2t, b2=b2p,
                dim=dim, hidden=hidden, out_dim=out_dim,
                d_pad=d_pad, h_pad=h_pad, o_pad=o_pad,
                compute_dtype=compute_dtype)


# ------------------------------ forward wrapper --------------------------------
def mlp_forward(x, params, *, activation="silu", max_rows_per_tile=512,
                max_hidden_per_tile=512):
    """Pallas TPU forward of the PyTorch MLP using pre-prepared params."""
    dim, hidden, out_dim = params["dim"], params["hidden"], params["out_dim"]
    d_pad, h_pad, o_pad = params["d_pad"], params["h_pad"], params["o_pad"]
    compute_dtype = params["compute_dtype"]
    bytesz = jnp.dtype(compute_dtype).itemsize

    orig_shape = x.shape
    rows = int(np.prod(orig_shape[:-1]))

    # Row tile: large to amortize per-step overhead, but keep >= 2 row steps
    # when rows allow so v7x's second TensorCore gets work.
    tm = min(_round_up(rows, 8), max_rows_per_tile)
    if rows >= 16 and _round_up(rows, tm) // tm < 2:
        tm = max(8, _round_up((rows + 1) // 2, 8))
    rows_pad = _round_up(rows, tm)

    # Hidden tile (K of matmul #2): whole hidden if small, else 128-aligned tile.
    th = min(h_pad, _round_up(max_hidden_per_tile, 128))
    while h_pad % th != 0:
        th -= 128
    n_h = h_pad // th

    x2 = x.reshape(rows, dim)
    x_p = jnp.zeros((rows_pad, d_pad), compute_dtype) \
             .at[:rows, :dim].set(x2.astype(compute_dtype))

    # Constant blocks (index_map never changes) -> single-buffered.
    const_mode = pl.Buffered(1)
    w1_mode = const_mode if n_h == 1 else None
    w2_mode = const_mode if n_h == 1 else None
    b1_mode = const_mode if n_h == 1 else None

    in_specs = [
        pl.BlockSpec((tm, d_pad), lambda i, j: (i, 0)),                       # x rows
        pl.BlockSpec((d_pad, th), lambda i, j: (0, j), pipeline_mode=w1_mode),  # W1^T
        pl.BlockSpec((1, th), lambda i, j: (0, j), pipeline_mode=b1_mode),      # b1
        pl.BlockSpec((th, o_pad), lambda i, j: (j, 0), pipeline_mode=w2_mode),  # W2^T
        pl.BlockSpec((1, o_pad), lambda i, j: (0, 0), pipeline_mode=const_mode),  # b2
    ]
    out_spec = pl.BlockSpec((tm, o_pad), lambda i, j: (i, 0))

    # VMEM budget sized to the actual resident buffers (+2x headroom),
    # clamped to v7x's 64 MiB physical ceiling.
    n_wbuf = 1 if n_h == 1 else 2
    resident = n_wbuf * (d_pad * th + th * o_pad) * bytesz   # weight buffers
    resident += (th + o_pad) * 4 * n_wbuf                    # bias buffers
    resident += 2 * tm * d_pad * bytesz                      # x double-buffer
    resident += 2 * tm * o_pad * 4                           # out double-buffer
    resident += tm * o_pad * 4                               # fp32 accumulator
    vmem_limit = int(min(64 * 1024 * 1024,
                         max(2 * resident, 16 * 1024 * 1024)))

    # Advisory cost based on the REAL (unpadded) problem size.
    cost = pl.CostEstimate(
        flops=2 * rows * dim * hidden + 2 * rows * hidden * out_dim,
        transcendentals=rows * hidden if activation == "silu" else 0,
        bytes_accessed=int(rows * dim * bytesz
                           + (dim * hidden + hidden * out_dim) * bytesz
                           + (hidden + out_dim) * 4
                           + rows * out_dim * 4),
    )

    kernel = functools.partial(_mlp_kernel, activation=activation,
                               compute_dtype=compute_dtype)

    out = pl.pallas_call(
        kernel,
        out_shape=jax.ShapeDtypeStruct((rows_pad, o_pad), jnp.float32),
        grid=(rows_pad // tm, n_h),
        in_specs=in_specs,
        out_specs=out_spec,
        scratch_shapes=[pltpu.VMEM((tm, o_pad), jnp.float32)],
        compiler_params=pltpu.CompilerParams(
            dimension_semantics=("parallel", "arbitrary"),
            vmem_limit_bytes=vmem_limit,
        ),
        cost_estimate=cost,
    )(x_p, params["w1t"], params["b1"], params["w2t"], params["b2"])

    return out[:rows, :out_dim].reshape(*orig_shape[:-1], out_dim)


# ------------------------------ pure-JAX reference ----------------------------
def ref_mlp(x, w1, b1, w2, b2, activation="silu"):
    z = x @ w1.T + b1
    if activation == "silu":
        h = jax.nn.silu(z)
    elif activation == "relu":
        h = jax.nn.relu(z)
    elif activation == "squared_relu":
        h = jnp.square(jax.nn.relu(z))
    else:
        raise ValueError(activation)
    return h @ w2.T + b2                      # dropout = identity (eval)


# ------------------------------ main ------------------------------------------
if __name__ == "__main__":
    key = jax.random.PRNGKey(0)
    kx, k1, kb1, k2, kb2 = jax.random.split(key, 5)

    BATCH, SEQ, DIM, HIDDEN = 2, 8, 32, 64
    x = jax.random.normal(kx, (BATCH, SEQ, DIM), jnp.float32)
    w1 = 0.02 * jax.random.normal(k1, (HIDDEN, DIM), jnp.float32)
    b1 = 0.02 * jax.random.normal(kb1, (HIDDEN,), jnp.float32)
    w2 = 0.02 * jax.random.normal(k2, (DIM, HIDDEN), jnp.float32)
    b2 = 0.02 * jax.random.normal(kb2, (DIM,), jnp.float32)

    params = prepare_mlp_params(w1, b1, w2, b2)          # one-time prep
    y = mlp_forward(x, params, activation="silu")
    y = jax.block_until_ready(y)

    ref = ref_mlp(x, w1, b1, w2, b2, activation="silu")
    # bf16 MXU operands with fp32 accumulation -> loosened tolerance.
    np.testing.assert_allclose(np.asarray(y), np.asarray(ref),
                               rtol=2e-2, atol=2e-3)

    assert y.shape == (BATCH, SEQ, DIM)
    print("KERNEL_OK")
</pallas_src>

<mosaic_0001>
module attributes {stable_mosaic.version = 11 : i64} {
  func.func @_mlp_kernel(%arg0: i32, %arg1: i32, %arg2: memref<8x128xbf16, #tpu.memory_space<vmem>>, %arg3: memref<128x128xbf16, #tpu.memory_space<vmem>>, %arg4: memref<1x128xf32, #tpu.memory_space<vmem>>, %arg5: memref<128x128xbf16, #tpu.memory_space<vmem>>, %arg6: memref<1x128xf32, #tpu.memory_space<vmem>>, %arg7: memref<8x128xf32, #tpu.memory_space<vmem>>, %arg8: memref<8x128xf32, #tpu.memory_space<vmem>>) attributes {dimension_semantics = [#tpu.dimension_semantics<parallel>, #tpu.dimension_semantics<arbitrary>], iteration_bounds = array<i64: 2, 1>, scalar_prefetch = 0 : i64, scratch_operands = 1 : i64, tpu.core_type = #tpu.core_type<tc>, window_params = [{transform_indices = @transform_0, window_bounds = array<i64: 8, 128>}, {pipeline_mode = #tpu.pipeline_mode<synchronous>, transform_indices = @transform_1, window_bounds = array<i64: 128, 128>}, {pipeline_mode = #tpu.pipeline_mode<synchronous>, transform_indices = @transform_2, window_bounds = array<i64: 1, 128>}, {pipeline_mode = #tpu.pipeline_mode<synchronous>, transform_indices = @transform_3, window_bounds = array<i64: 128, 128>}, {pipeline_mode = #tpu.pipeline_mode<synchronous>, transform_indices = @transform_4, window_bounds = array<i64: 1, 128>}, {transform_indices = @transform_5, window_bounds = array<i64: 8, 128>}]} {
    %c0_i32 = arith.constant 0 : i32
    %0 = arith.cmpi eq, %arg1, %c0_i32 : i32
    %1 = arith.extui %0 : i1 to i32
    %c0_i32_0 = arith.constant 0 : i32
    %2 = arith.cmpi ne, %1, %c0_i32_0 : i32
    scf.if %2 {
      %cst_16 = arith.constant 0.000000e+00 : f32
      %24 = vector.broadcast %cst_16 : f32 to vector<8x128xf32>
      %c0_17 = arith.constant 0 : index
      %c0_18 = arith.constant 0 : index
      %25 = vector.load %arg8[%c0_17, %c0_18] : memref<8x128xf32, #tpu.memory_space<vmem>>, vector<8x128xf32>
      tpu.vector_store %arg8[%c0_17, %c0_18], %24 {strides = array<i32>} : memref<8x128xf32, #tpu.memory_space<vmem>>, vector<8x128xf32>,
    } else {
    }
    %c0 = arith.constant 0 : index
    %c0_1 = arith.constant 0 : index
    %3 = vector.load %arg2[%c0, %c0_1] : memref<8x128xbf16, #tpu.memory_space<vmem>>, vector<8x128xbf16>
    %c0_2 = arith.constant 0 : index
    %c0_3 = arith.constant 0 : index
    %4 = vector.load %arg3[%c0_2, %c0_3] : memref<128x128xbf16, #tpu.memory_space<vmem>>, vector<128x128xbf16>
    %cst = arith.constant dense<0.000000e+00> : vector<8x128xf32>
    %5 = tpu.matmul %3, %4, %cst {dimension_numbers = #tpu.dot_dimension_numbers<[1], [0], [0], [1], [0, 0, 1, 1], [], []>} : vector<8x128xbf16>, vector<128x128xbf16>, vector<8x128xf32> -> vector<8x128xf32>
    %c0_4 = arith.constant 0 : index
    %c0_5 = arith.constant 0 : index
    %6 = vector.load %arg4[%c0_4, %c0_5] : memref<1x128xf32, #tpu.memory_space<vmem>>, vector<1x128xf32>
    %7 = vector.broadcast %6 : vector<1x128xf32> to vector<8x128xf32>
    %8 = arith.addf %5, %7 : vector<8x128xf32>
    %9 = arith.negf %8 : vector<8x128xf32>
    %10 = math.exp %9 : vector<8x128xf32>
    %cst_6 = arith.constant 1.000000e+00 : f32
    %11 = vector.broadcast %cst_6 : f32 to vector<8x128xf32>
    %12 = arith.addf %11, %10 : vector<8x128xf32>
    %13 = arith.divf %11, %12 : vector<8x128xf32>
    %14 = arith.mulf %8, %13 : vector<8x128xf32>
    %c0_7 = arith.constant 0 : index
    %c0_8 = arith.constant 0 : index
    %15 = vector.load %arg8[%c0_7, %c0_8] : memref<8x128xf32, #tpu.memory_space<vmem>>, vector<8x128xf32>
    %16 = arith.truncf %14 : vector<8x128xf32> to vector<8x128xbf16>
    %c0_9 = arith.constant 0 : index
    %c0_10 = arith.constant 0 : index
    %17 = vector.load %arg5[%c0_9, %c0_10] : memref<128x128xbf16, #tpu.memory_space<vmem>>, vector<128x128xbf16>
    %cst_11 = arith.constant dense<0.000000e+00> : vector<8x128xf32>
    %18 = tpu.matmul %16, %17, %cst_11 {dimension_numbers = #tpu.dot_dimension_numbers<[1], [0], [0], [1], [0, 0, 1, 1], [], []>} : vector<8x128xbf16>, vector<128x128xbf16>, vector<8x128xf32> -> vector<8x128xf32>
    %19 = arith.addf %15, %18 : vector<8x128xf32>
    %c0_12 = arith.constant 0 : index
    %c0_13 = arith.constant 0 : index
    %20 = vector.load %arg8[%c0_12, %c0_13] : memref<8x128xf32, #tpu.memory_space<vmem>>, vector<8x128xf32>
    tpu.vector_store %arg8[%c0_12, %c0_13], %19 {strides = array<i32>} : memref<8x128xf32, #tpu.memory_space<vmem>>, vector<8x128xf32>,
    %c0_i32_14 = arith.constant 0 : i32
    %21 = arith.cmpi eq, %arg1, %c0_i32_14 : i32
    %22 = arith.extui %21 : i1 to i32
    %c0_i32_15 = arith.constant 0 : i32
    %23 = arith.cmpi ne, %22, %c0_i32_15 : i32
    scf.if %23 {
      %c0_16 = arith.constant 0 : index
      %c0_17 = arith.constant 0 : index
      %24 = vector.load %arg8[%c0_16, %c0_17] : memref<8x128xf32, #tpu.memory_space<vmem>>, vector<8x128xf32>
      %c0_18 = arith.constant 0 : index
      %c0_19 = arith.constant 0 : index
      %25 = vector.load %arg6[%c0_18, %c0_19] : memref<1x128xf32, #tpu.memory_space<vmem>>, vector<1x128xf32>
      %26 = vector.broadcast %25 : vector<1x128xf32> to vector<8x128xf32>
      %27 = arith.addf %24, %26 : vector<8x128xf32>
      %c0_20 = arith.constant 0 : index
      %c0_21 = arith.constant 0 : index
      %28 = vector.load %arg7[%c0_20, %c0_21] : memref<8x128xf32, #tpu.memory_space<vmem>>, vector<8x128xf32>
      tpu.vector_store %arg7[%c0_20, %c0_21], %27 {strides = array<i32>} : memref<8x128xf32, #tpu.memory_space<vmem>>, vector<8x128xf32>,
    } else {
    }
    return
  }
  func.func @transform_0(%arg0: i32, %arg1: i32) -> (i32, i32) {
    %c0_i32 = arith.constant 0 : i32
    %c0_i32_0 = arith.constant 0 : i32
    return %arg0, %c0_i32 : i32, i32
  }
  func.func @transform_1(%arg0: i32, %arg1: i32) -> (i32, i32) {
    %c0_i32 = arith.constant 0 : i32
    %c0_i32_0 = arith.constant 0 : i32
    return %c0_i32, %arg1 : i32, i32
  }
  func.func @transform_2(%arg0: i32, %arg1: i32) -> (i32, i32) {
    %c0_i32 = arith.constant 0 : i32
    %c0_i32_0 = arith.constant 0 : i32
    return %c0_i32, %arg1 : i32, i32
  }
  func.func @transform_3(%arg0: i32, %arg1: i32) -> (i32, i32) {
    %c0_i32 = arith.constant 0 : i32
    %c0_i32_0 = arith.constant 0 : i32
    return %arg1, %c0_i32 : i32, i32
  }
  func.func @transform_4(%arg0: i32, %arg1: i32) -> (i32, i32) {
    %c0_i32 = arith.constant 0 : i32
    %c0_i32_0 = arith.constant 0 : i32
    %c0_i32_1 = arith.constant 0 : i32
    return %c0_i32, %c0_i32_0 : i32, i32
  }
  func.func @transform_5(%arg0: i32, %arg1: i32) -> (i32, i32) {
    %c0_i32 = arith.constant 0 : i32
    %c0_i32_0 = arith.constant 0 : i32
    return %arg0, %c0_i32 : i32, i32
  }
}

</mosaic_0001>

<bundles_post_ra>
// kernel: tpu_custom_call.1
= control target key start
LH: loop header
LB: loop body
LE: loop exit
PB: predicated region body
PF: predicated region fallthrough
CT: control target
= control target key end

     0   :  { %s1286_s0 = inlined_call_operand.hbm [shape: bf16[16,128], index: 0, kind: input, shape index: {}]   ;;  %s1287_s1 = inlined_call_operand.hbm [shape: bf16[128,128], index: 1, kind: input, shape index: {}]   ;;  %s1288_s2 = inlined_call_operand.vmem [shape: f32[1,128], index: 2, kind: input, shape index: {}]   ;;  %s1289_s3 = inlined_call_operand.hbm [shape: bf16[128,128], index: 3, kind: input, shape index: {}]   ;;  %s1290_s4 = inlined_call_operand.vmem [shape: f32[1,128], index: 4, kind: input, shape index: {}]   ;;  %s1291_s5 = inlined_call_operand.hbm [shape: f32[16,128], index: 5, kind: output, shape index: {}]  }
   0x1   :  { %1295 = sst [smem:[#allocation13_spill]] %s1287_s1 }
   0x2   :  { %10 = vsyncpa [#allocation4], 0 }
   0x3   :  { %12 = vsyncpa [#allocation4 + $0x1], 0 }
   0x4   :  { %13 = vsyncpa [#allocation7], 0 }
   0x5   :  { %14 = vsyncpa [#allocation5], 0 }
   0x6   :  { %16 = vsyncpa [#allocation5 + $0x1], 0  ;;  %s1090_s18 = smov 0   ;;  %s1092_s19 = smov 0  }
   0x7   :  { %s1094_s20 = smov 0   ;;  %s1096_s21 = smov 0  }
   0x8   :  { %s1098_s22 = smov 0   ;;  %s1100_s23 = smov 0  }
   0x9 LB: > { %s684_s24 = sadd.s32 4294967295, %s1050_s23   ;;  %s685_s25 = sadd.s32 4294967294, %s1050_s23   ;;  %s1050_s23 = sphi %s1100_s23, %s22_s23   ;;  %s1046_s22 = sphi %s1098_s22, %s1313_s22   ;;  %s1042_s21 = sphi %s1096_s21, %s1312_s21   ;;  %s1038_s20 = sphi %s1094_s20, %s1311_s20   ;;  %s1034_s19 = sphi %s1092_s19, %s1310_s19   ;;  %s1030_s18 = sphi %s1090_s18, %s1309_s18  }
   0xa   : > { %p54_p0 = scmp.ne.s32.totalorder %s1034_s19, %s1030_s18  ;;  %p1124_p1 = scmp.eq.s32.totalorder %s684_s24, 0 }
   0xb   : > { %p1128_p2 = scmp.eq.s32.totalorder %s684_s24, 1  ;;  %p183_p3 = scmp.eq.s32.totalorder %s685_s25, 1 }
   0xc   : > { %s1296_s26 = scalar_select %p1124_p1, 1, 0 }
   0xd   : > { %p1134_p4 = por %p1124_p1, %p54_p0  ;;  %p686_p5 = scmp.ge.s32.totalorder %s1050_s23, 1 }
   0xe   : > { %p1139_p6 = por %p183_p3, %p54_p0  ;;  %p190_p7 = scmp.lt.s32.totalorder %s1050_s23, 3 }
   0xf   : > { %s1298_s28 = scalar_select %p1134_p4, 1, 0 }
  0x10   : > { %s1299_s29 = scalar_select %p1139_p6, 1, 0 }
  0x11   : > { %p1144_p8 = pnand %p686_p5, %p190_p7  ;;  %s1052_s6 = smov [#allocation6]  }
  0x12   : > { %s204_s7 = sshll.u32 %s1052_s6, 4  ;;  %s1053_s9 = smov [#allocation8]   ;;  %s205_s7 = int_to_ptr.vmem [resolvable:$true] %s204_s7 }
  0x13   : > { %p791_p9 = pneg %p1144_p8  ;;  %s226_s10 = sshll.u32 %s1053_s9, 4  ;;  %s227_s10 = int_to_ptr.vmem [resolvable:$true] %s226_s10 }
  0x14   : > { %s897_s11 = scalar_lea.vmem %s205_s7, 1024  ;;  %p905_p5 = scmp.lt.s32.totalorder %s205_s7, %s205_s7 }
  0x15   : > { %p1153_p11 = pnand %p791_p9, %p1124_p1  ;;  %p898_p13 = scmp.ne.s32.totalorder %s205_s7, %s897_s11 }
  0x16   : > { %p906_p7 = scmp.lt.s32.totalorder %s897_s11, %s897_s11 }
  0x17   : > { %p888_p12 = pneg %p1153_p11 }
  0x18   : > { %p907_p10 = por %p906_p7, %p905_p5 }
  0x19   : > { %p900_p0 = pnand %p898_p13, %p888_p12 }
  0x1b   : > { %p901_p3 = pneg %p900_p0 }
  0x1d   : > { %p908_p9 = pnand %p907_p10, %p901_p3 }
  0x1f   : > { %911 = shalt.err (!%p908_p9)
}
  0x20   : > { %s1054_s12 = smov 64   ;;  %s1055_s13 = smov 4  }
  0x21   : > { %s1302_s1 = sld [smem:[#allocation13_spill]]  ;;  %s923_s16 = scalar_lea.vmem %s227_s10, 1024 }
  0x22   : > { %p924_p6 = scmp.ne.s32.totalorder %s227_s10, %s923_s16  ;;  %p931_p1 = scmp.lt.s32.totalorder %s227_s10, %s227_s10 }
  0x23   : > { %p932_p4 = scmp.lt.s32.totalorder %s923_s16, %s923_s16 }
  0x24   : > { %p926_p13 = pnand %p924_p6, %p888_p12 }
  0x25   : > { %p933_p5 = por %p932_p4, %p931_p1 }
  0x26   : > { %p927_p0 = pneg %p926_p13 }
  0x27   : > { %794 = dma.hbm_to_vmem [thread:$0]  (!%p1153_p11), %s1302_s1, 1024, %s205_s7, [#allocation7], %s1054_s12, %s1054_s12, %s1055_s13  }
  0x28   : > { %p934_p10 = pnand %p933_p5, %p927_p0 }
  0x2a   : > { %937 = shalt.err (!%p934_p10)
}
  0x2b   : > { %797 = dma.hbm_to_vmem [thread:$0]  (!%p1153_p11), %s1289_s3, 1024, %s227_s10, [#allocation7], %s1054_s12, %s1054_s12, %s1055_s13  }
  0x2c   : > { %s34_s25 = sadd.s32 1, %s1046_s22  ;;  %s41_s6 = sadd.s32 1, %s1038_s20 }
  0x2d   : > { %p36_p1 = scmp.ge.s32.totalorder %s34_s25, 2  ;;  %p48_p4 = scmp.ne.s32.totalorder %s1038_s20, %s1034_s19 }
  0x2e   : > { %p49_p6 = scmp.eq.s32.totalorder %s1050_s23, 0  ;;  %p808_p12 = scmp.lt.s32.totalorder %s1050_s23, 2 }
  0x2f   : > { %s1315_s25 = smov (%p36_p1, %s34_s25), 0  ;;  %p1185_p7 = por %p1128_p2, %p48_p4 }
  0x30   : > { %p50_p3 = por %p49_p6, %p48_p4  ;;  %s38_s8 = ssub.s32 %s1046_s22, %s1315_s25 }
  0x31   : > { %s243_s9 = sand.u32 1, %s1038_s20   ;;  %p39_p9 = scmp.eq.s32.totalorder %s38_s8, 0 }
  0x32   : > { %s691_s10 = sshll.u32 %s243_s9, 2  ;;  %s692_s11 = sshll.u32 %s1046_s22, 6 }
  0x33   : > { %s1194_s12 = scalar_select %p39_p9, %s1038_s20, %s41_s6  }
  0x34   : > { %s252_s15 = scalar_lea.hbm %s1286_s0, %s692_s11  ;;  %s247_s16 = scalar_lea.vmem [#allocation3], %s691_s10 }
  0x35   : > { %s254_s17 = sshll.u32 %s247_s16, 4  ;;  %p1201_p11 = pnand %p808_p12, %p50_p3  ;;  %s255_s17 = int_to_ptr.vmem [resolvable:$true] %s254_s17 }
  0x36   : > { %s244_s24 = scalar_lea.sflag [#allocation4], %s243_s9  ;;  %s951_s8 = scalar_lea.vmem %s255_s17, 64 }
  0x37   : > { %p940_p2 = pneg %p1201_p11  ;;  %p952_p13 = scmp.ne.s32.totalorder %s255_s17, %s951_s8 }
  0x38   : > { %s1056_s6 = smov [#allocation3]  }
  0x39   : > { %p954_p0 = pnand %p952_p13, %p940_p2  ;;  %s956_s1 = sshll.u32 %s1056_s6, 4  ;;  %s957_s1 = int_to_ptr.vmem [resolvable:$false] %s956_s1 }
  0x3a   : > { %s958_s11 = scalar_lea.vmem %s957_s1, 128  ;;  %p959_p10 = scmp.lt.s32.totalorder %s255_s17, %s957_s1 }
  0x3b   : > { %p955_p5 = pneg %p954_p0  ;;  %p960_p1 = scmp.lt.s32.totalorder %s958_s11, %s951_s8 }
  0x3d   : > { %p961_p4 = por %p960_p1, %p959_p10 }
  0x3f   : > { %p962_p6 = pnand %p961_p4, %p955_p5 }
  0x41   : > { %965 = shalt.err (!%p962_p6)
}
  0x42   : > { %801 = dma.hbm_to_vmem [thread:$0]  (!%p1201_p11), %s252_s15, 64, %s255_s17, %s244_s24  }
  0x43   : > { %263 = sbr.rel (%p1144_p8) target bundleno = 550 (0x226), region = 40  ;;  %s1212_s9 = sand.u32 (!%p1144_p8), 1, %s1034_s19  }
  0x44   : > { %s694_s10 = sshll.u32 (!%p1144_p8), %s1212_s9, 2  ;;  %s266_s13 = scalar_lea.sflag (!%p1144_p8), [#allocation4], %s1212_s9 }
  0x45   : > { %s1216_s14 = scalar_lea.vmem (!%p1144_p8), [#allocation3], %s694_s10  ;;  %p1305_p12 = scmp.ne.s32.totalorder (!%p1144_p8), %s1298_s28, 0 }
  0x48   : > { %1017 = dma.done.wait (%p1305_p12), %s266_s13, 64  }
  0x49   : > { %1019 = vsyncadd (%p1305_p12), %s266_s13, 4294967232  ;;  %p1306_p3 = scmp.ne.s32.totalorder %s1296_s26, 0 }
  0x4b   : > { %1021 = dma.done.wait (%p1306_p3), [#allocation7], 2048  }
  0x4c   : > { %1023 = vsyncadd (%p1306_p3), [#allocation7], 4294965248  ;;  %v1057_v0 = vmov 0.0   ;;  %vm1058_vm0 = vmmov 0   ;;  %v866_v1 = vld [vmem:[#allocation6 + $0x38] sm:$0xff]   ;;  %v867_v2 = vld [vmem:[#allocation6 + $0x30] sm:$0xff]  }
  0x4d   : > { %739 = vmatprep.subr.bf16.mxu0 %v1057_v0  ;;  %755 = vmatprep.mubr.msk.bf16.mxu0 %vm1058_vm0, %v1057_v0  ;;  %v868_v3 = vld [vmem:[#allocation6 + $0x28] sm:$0xff]   ;;  %v869_v4 = vld [vmem:[#allocation6 + $0x20] sm:$0xff]   ;;  %v870_v5 = vld [vmem:[#allocation6 + $0x18] sm:$0xff]   ;;  %s697_s28 = sshll.u32 %s1212_s9, 3  ;;  %s718_s16 = sshll.u32 %s1042_s21, 7 }
  0x4e   : > { %759 = vmatprep.subr.bf16.mxu1 %v1057_v0  ;;  %775 = vmatprep.mubr.msk.bf16.mxu1 %vm1058_vm0, %v1057_v0  ;;  %v871_v6 = vld [vmem:[#allocation6 + $0x10] sm:$0xff]   ;;  %v872_v7 = vld [vmem:[#allocation6 + $0x8] sm:$0xff]   ;;  %v873_v8 = vld [vmem:[#allocation6] sm:$0xff]   ;;  %s306_s17 = scalar_lea.vmem [#allocation9], %s697_s28  ;;  %s1238_s6 = scalar_lea.hbm %s1291_s5, %s718_s16 }
  0x4f   : > { %740 = vmatpush3.bf16.msra.mxu0 %v866_v1  ;;  %v317_v9 = vld [vmem:[%s1216_s14] sm:$0xf]  ;;  %v875_v11 = vld [vmem:[#allocation8 + $0x30] sm:$0xff]   ;;  %v876_v12 = vld [vmem:[#allocation8 + $0x28] sm:$0xff]   ;;  %s571_s27 = sshll.u32 %s306_s17, 4  ;;  %s558_s11 = scalar_lea.sflag [#allocation5], %s1212_s9  ;;  %s1240_s27 = int_to_ptr.vmem [resolvable:$true] %s571_s27 }
  0x50   : > { %741 = vmatprep.subr.bf16.mxu0 %v1057_v0  ;;  %v874_v10 = vld [vmem:[#allocation8 + $0x38] sm:$0xff]   ;;  %v877_v13 = vld [vmem:[#allocation8 + $0x20] sm:$0xff]   ;;  %v879_v15 = vld [vmem:[#allocation8 + $0x10] sm:$0xff]   ;;  %s966_s10 = scalar_lea.vmem %s1240_s27, 128  ;;  %s1059_s21 = smov [#allocation9]  }
  0x51   : > { %760 = vmatpush3.bf16.msra.mxu1 %v874_v10  ;;  %v878_v14 = vld [vmem:[#allocation8 + $0x18] sm:$0xff]   ;;  %v880_v16 = vld [vmem:[#allocation8 + $0x8] sm:$0xff]   ;;  %v881_v17 = vld [vmem:[#allocation8] sm:$0xff]   ;;  %p967_p8 = scmp.ne.s32.totalorder %s1240_s27, %s966_s10  ;;  %s970_s13 = sshll.u32 %s1059_s21, 4  ;;  %s971_s13 = int_to_ptr.vmem [resolvable:$false] %s970_s13 }
  0x52   : > { %761 = vmatprep.subr.bf16.mxu1 %v1057_v0  ;;  %v698_v18 = vld [vmem:[%s1288_s2] ss:$0 sm:$0xff]  ;;  %s972_s14 = scalar_lea.vmem %s971_s13, 256  ;;  %p973_p2 = scmp.lt.s32.totalorder %s1240_s27, %s971_s13 }
  0x53   : > { %742 = vmatpush3.bf16.msra.mxu0 %v867_v2  ;;  %v716_v30 = vld [vmem:[%s1290_s4] ss:$0 sm:$0xff]  ;;  %p968_p9 = pnand %p967_p8, %p1185_p7  ;;  %p974_p13 = scmp.lt.s32.totalorder %s972_s14, %s966_s10 }
  0x54   : > { %743 = vmatprep.subr.bf16.mxu0 %v1057_v0 }
  0x55   : > { %762 = vmatpush3.bf16.msra.mxu1 %v875_v11  ;;  %p969_p11 = pneg %p968_p9  ;;  %p975_p0 = por %p974_p13, %p973_p2 }
  0x56   : > { %763 = vmatprep.subr.bf16.mxu1 %v1057_v0 }
  0x57   : > { %744 = vmatpush3.bf16.msra.mxu0 %v868_v3  ;;  %p976_p5 = pnand %p975_p0, %p969_p11 }
  0x58   : > { %745 = vmatprep.subr.bf16.mxu0 %v1057_v0 }
  0x59   : > { %764 = vmatpush3.bf16.msra.mxu1 %v876_v12 }
  0x5a   : > { %765 = vmatprep.subr.bf16.mxu1 %v1057_v0 }
  0x5b   : > { %746 = vmatpush3.bf16.msra.mxu0 %v869_v4 }
  0x5c   : > { %747 = vmatprep.subr.bf16.mxu0 %v1057_v0 }
  0x5d   : > { %766 = vmatpush3.bf16.msra.mxu1 %v877_v13 }
  0x5e   : > { %767 = vmatprep.subr.bf16.mxu1 %v1057_v0 }
  0x5f   : > { %748 = vmatpush3.bf16.msra.mxu0 %v870_v5 }
  0x60   : > { %749 = vmatprep.subr.bf16.mxu0 %v1057_v0 }
  0x61   : > { %768 = vmatpush3.bf16.msra.mxu1 %v878_v14 }
  0x62   : > { %769 = vmatprep.subr.bf16.mxu1 %v1057_v0 }
  0x63   : > { %750 = vmatpush3.bf16.msra.mxu0 %v871_v6 }
  0x64   : > { %751 = vmatprep.subr.bf16.mxu0 %v1057_v0 }
  0x65   : > { %770 = vmatpush3.bf16.msra.mxu1 %v879_v15 }
  0x66   : > { %771 = vmatprep.subr.bf16.mxu1 %v1057_v0 }
  0x67   : > { %752 = vmatpush3.bf16.msra.mxu0 %v872_v7 }
  0x68   : > { %753 = vmatprep.subr.bf16.mxu0 %v1057_v0 }
  0x69   : > { %772 = vmatpush3.bf16.msra.mxu1 %v880_v16 }
  0x6a   : > { %773 = vmatprep.subr.bf16.mxu1 %v1057_v0 }
  0x6b   : > { %754 = vmatpush3.bf16.msra.mxu0 %v873_v8 }
  0x6d   : > { %774 = vmatpush3.bf16.msra.mxu1 %v881_v17 }
  0x6e   : > { %756 = vmatmul.mubr.bf16.vlgmr.msra.gmra.mxu0 %v317_v9 }
 0x12e   : > { %v423_v19 = vpop.f32.mrf.mxu0 }
 0x12f   : > { %v424_v20 = vadd.f32 %v698_v18, %v423_v19 }
 0x130   : > { %v757_v21 = vpop.f32.mrf.mxu0 }
 0x131   : > { %v707_v22 = vmul.f32 -1.442695, %v424_v20 }
 0x132   : > { %v426_v23 = vpop.f32.mrf.mxu0 }
 0x133   : > { %882 = vpow2.f32 %v707_v22 }
 0x134   : > { %v758_v24 = vpop.f32.mrf.mxu0 }
 0x140   : > { %v883_v25 = vpop.eup %882 }
 0x141   : > { %v432_v26 = vadd.f32 1.0, %v883_v25 }
 0x143   : > { %884 = vrcp.f32 %v432_v26 }
 0x150   : > { %v885_v27 = vpop.eup %884 }
 0x151   : > { %v435_v28 = vmul.f32 %v885_v27, %v424_v20 }
 0x153   : > { %v437_v29 = vpack.c.bf16 %v435_v28, %v435_v28 }
 0x155   : > { %776 = vmatmul.mubr.bf16.vlgmr.msra.gmra.mxu1 %v437_v29 }
 0x215   : > { %v536_v31 = vpop.f32.mrf.mxu1 }
 0x216   : > { %v555_v32 = vadd.f32 %v716_v30, %v536_v31 }
 0x217   : > { %v777_v33 = vpop.f32.mrf.mxu1 }
 0x218   : > { %556 = vst [vmem:[%s306_s17] sm:$0xff] %v555_v32 }
 0x219   : > { %v539_v34 = vpop.f32.mrf.mxu1 }
 0x21a   : > { %979 = shalt.err (!%p976_p5)
}
 0x21b   : > { %s980_s1 = scalar_lea.hbm %s1238_s6, 128  ;;  %s984_s28 = scalar_lea.hbm %s1291_s5, 256 }
 0x21c   : > { %p981_p10 = scmp.ne.s32.totalorder %s1238_s6, %s980_s1  ;;  %p985_p6 = scmp.lt.s32.totalorder %s1238_s6, %s1291_s5 }
 0x21d   : > { %p986_p12 = scmp.lt.s32.totalorder %s984_s28, %s980_s1 }
 0x21e   : > { %p982_p1 = pnand %p981_p10, %p1185_p7 }
 0x21f   : > { %p987_p3 = por %p986_p12, %p985_p6 }
 0x220   : > { %p983_p4 = pneg %p982_p1 }
 0x222   : > { %p988_p8 = pnand %p987_p3, %p983_p4 }
 0x224   : > { %991 = shalt.err (!%p988_p8)
}
 0x225   : > { %789 = dma.vmem_to_hbm [thread:$0]  (%p1185_p7), %s1240_s27, 128, %s1238_s6, %s558_s11   ;;  %v778_v35 = vpop.f32.mrf.mxu1 }
 0x226 PF: > { %s583_s16 = sand.u32 1, %s1030_s18   ;;  %p1307_p9 = scmp.ne.s32.totalorder %s1299_s29, 0 }
 0x227   : > { %p1308_p11 = scmp.ge.s32.totalorder %s1050_s23, 2  ;;  %s584_s17 = scalar_lea.sflag [#allocation5], %s583_s16 }
 0x229   : > { %p803_p2 = pnand %p1308_p11, %p1307_p9 }
 0x22b   : > { %p804_p13 = pneg %p803_p2 }
 0x22d   : > { %1025 = dma.done.wait (%p804_p13), %s584_s17, 128  }
 0x22e   : > { %1027 = vsyncadd (%p804_p13), %s584_s17, 4294967168  ;;  %s22_s23 = sadd.s32 1, %s1050_s23   ;;  %s1309_s18 = smov %s1034_s19 }
 0x22f   : > { %p19_p0 = scmp.ge.s32.totalorder %s22_s23, 4   ;;  %s1310_s19 = smov %s1038_s20 }
 0x230   : > { %s1311_s20 = smov %s1194_s12  ;;  %s1312_s21 = smov %s1046_s22 }
 0x231   : > { %s1313_s22 = smov %s1315_s25  ;;  %21 = sbr.rel (!%p19_p0) target bundleno = 9 (0x9), region = 106 }
 0x236   :  { %589 = vsyncpa [#allocation4], 1 }
 0x237   :  { %591 = vsyncpa [#allocation4 + $0x1], 1 }
 0x238   :  { %592 = vsyncpa [#allocation7], 1 }
 0x239   :  { %593 = vsyncpa [#allocation5], 1 }
 0x23a   :  { %595 = vsyncpa [#allocation5 + $0x1], 1 }

</bundles_post_ra>
